<compile_context>
chip_gen: v7x
topology: tpu7x:2x2x1
jax: 0.10.0
libtpu: 0.0.40
codegen_flags: <defaults>
</compile_context>

<pallas_src>
import functools

import jax
import jax.numpy as jnp
import numpy as np
from jax.experimental import pallas as pl
from jax.experimental.pallas import tpu as pltpu


# ---------------------------------------------------------------------------
# Pallas kernel
# ---------------------------------------------------------------------------
def _levelscinet_kernel(x_ref, w1_ref, b1_ref, w2_ref, b2_ref, out_ref,
                        *, k1, pad_l, pad_r, lc, data_len, c):
    two_c = x_ref.shape[1]
    n = x_ref.shape[2]

    def roll_l(z, shift):
        """Lane roll, jnp.roll convention (positive shift -> higher indices)."""
        shift = shift % n
        if shift == 0:
            return z
        return pltpu.roll(z, shift, 1)

    # Per-lane position inside its batch chunk (static iota; no extra input).
    pos = jax.lax.broadcasted_iota(jnp.int32, (two_c, n), 1) % lc
    left_mask = pos < pad_l
    right_mask = pos >= pad_l + data_len

    def repad(z):
        """Replication-pad every chunk in place.  Left/right masks are
        disjoint, so both directions advance one lane per pass."""
        for _ in range(max(pad_l, pad_r)):
            z = jnp.where(left_mask, roll_l(z, -1),
                          jnp.where(right_mask, roll_l(z, 1), z))
        return z

    def fused_branch(xp, w1, b1, w2, b2):
        """Conv1d(k1) -> LeakyReLU(0.01) -> [Dropout=id] -> Conv1d(3) -> Tanh
        for a block-diagonal pair of branches, as two full-width im2col
        matmuls.  Lane j holds the conv output of the window starting at j;
        out-of-chunk windows give bounded (tanh) garbage handled by the
        caller."""
        xs = jnp.concatenate([roll_l(xp, -k) for k in range(k1)], axis=0)
        h = jnp.dot(w1, xs.astype(w1.dtype),
                    preferred_element_type=jnp.float32) + b1            # (2Ch, N)
        h = jnp.maximum(h, 0.01 * h)                                    # LeakyReLU(0.01)
        # TODO(synk): nn.Dropout(p) is stochastic in train mode; identity here (eval).
        hs = jnp.concatenate([roll_l(h, -k) for k in range(3)], axis=0)
        y = jnp.tanh(jnp.dot(w2, hs.astype(w2.dtype),
                             preferred_element_type=jnp.float32) + b2)  # (2C, N)
        # Re-align so each chunk's valid outputs sit at lanes [pad_l, pad_l+L).
        return roll_l(y, pad_l)

    # Rows [0:C] = even stream, rows [C:2C] = odd stream.
    x = repad(x_ref[0].astype(jnp.float32))

    # Fused phi(even) / psi(odd).
    g = fused_branch(x, w1_ref[0], b1_ref[0], w2_ref[0], b2_ref[0])
    d = x[c:] * jnp.exp(g[:c])          # d = odd  * exp(phi(even))
    cc = x[:c] * jnp.exp(g[c:])         # c = even * exp(psi(odd))
    dc = repad(jnp.concatenate([d, cc], axis=0))

    # Fused U(d) / P(c).
    up = fused_branch(dc, w1_ref[1], b1_ref[1], w2_ref[1], b2_ref[1])
    even_up = dc[c:] + up[:c]           # even_update = c + U(d)
    odd_up = dc[:c] - up[c:]            # odd_update  = d - P(c)
    out_ref[0] = jnp.concatenate([even_up, odd_up], axis=0).astype(out_ref.dtype)


# ---------------------------------------------------------------------------
# Wrapper (parameter plumbing, splitting, batch->lane packing = glue)
# ---------------------------------------------------------------------------
def init_params(key, in_planes, hidden_size, kernel_size):
    ch = int(in_planes * hidden_size)
    params = {}
    for name in ("phi", "psi", "U", "P"):
        key, k1, k2, k3, k4 = jax.random.split(key, 5)
        params[name] = {
            "w1": 0.2 * jax.random.normal(k1, (ch, in_planes, kernel_size), jnp.float32),
            "b1": 0.1 * jax.random.normal(k2, (ch,), jnp.float32),
            "w2": 0.2 * jax.random.normal(k3, (in_planes, ch, 3), jnp.float32),
            "b2": 0.1 * jax.random.normal(k4, (in_planes,), jnp.float32),
        }
    return params


def _pad_amounts(kernel_size, dilation=1):
    if kernel_size % 2 == 0:
        pad_l = dilation * (kernel_size - 2) // 2 + 1
        pad_r = dilation * kernel_size // 2 + 1
    else:
        pad_l = dilation * (kernel_size - 1) // 2 + 1
        pad_r = dilation * (kernel_size - 1) // 2 + 1
    return pad_l, pad_r


def _split_even_odd(x):
    """Torch Splitting: even/odd time split with replicate-pad of shorter half."""
    x_even = x[:, ::2, :]
    x_odd = x[:, 1::2, :]
    even_len, odd_len = x_even.shape[1], x_odd.shape[1]
    flag = 0
    if odd_len < even_len:
        pad = even_len - odd_len
        x_odd = jnp.concatenate(
            [x_odd, jnp.repeat(x_odd[:, -1:, :], pad, axis=1)], axis=1)
        flag = 1
    elif even_len < odd_len:
        pad = odd_len - even_len
        x_even = jnp.concatenate(
            [x_even, jnp.repeat(x_even[:, -1:, :], pad, axis=1)], axis=1)
        flag = 2
    return x_even, x_odd, flag


def level_scinet_forward(x, params, kernel_size, *, batch_block=None,
                         matmul_dtype=jnp.bfloat16):
    """x: (B, T, C) -> (even_update, odd_update): (B, ceil(T/2), C), (B, floor(T/2), C)."""
    B, T, C = x.shape
    pad_l, pad_r = _pad_amounts(kernel_size)

    x_even, x_odd, flag = _split_even_odd(x)
    L = x_even.shape[1]
    lc = L + pad_l + pad_r                       # per-batch padded chunk length
    two_c = 2 * C
    ch = params["phi"]["w1"].shape[0]
    two_ch = 2 * ch
    k1 = kernel_size
    mm_bytes = jnp.dtype(matmul_dtype).itemsize

    # ---- choose batch_block: large lane blocks, VMEM-aware, multi-TC aware --
    def n_pad_for(bb):
        return max(128, -(-(bb * lc) // 128) * 128)

    def vmem_estimate(bb):
        npd = n_pad_for(bb)
        per_lane = (4 * two_c * 4              # in/out tiles (double-buffered)
                    + k1 * two_c * mm_bytes    # conv1 im2col stack
                    + 3 * two_ch * mm_bytes    # conv2 im2col stack
                    + 2 * two_ch * 4           # conv1 activations
                    + 8 * two_c * 4)           # x, g, d, c, dc, up, out temps
        weights = ((two_ch * k1 * two_c + two_c * 3 * two_ch) * mm_bytes
                   + (two_ch + two_c) * 4)
        return npd * per_lane + weights

    if batch_block is None:
        target_lanes = 4096                    # 2k-8k lane sweet spot
        batch_block = max(1, min(B, max(1, target_lanes // lc)))
        # Keep >=2 grid steps when the part exposes multiple TensorCores (v7x)
        # so the "parallel" grid axis can shard across them.
        n_tc = getattr(jax.devices()[0], "num_cores", 1) or 1
        if n_tc > 1 and B >= 2:
            batch_block = max(1, min(batch_block, -(-B // n_tc)))
    vmem_budget = 40 * 1024 * 1024             # stays under v7x's 64 MiB physical
    while batch_block > 1 and vmem_estimate(batch_block) > vmem_budget:
        batch_block -= 1

    num_blocks = -(-B // batch_block)
    b_pad = num_blocks * batch_block
    n_flat = batch_block * lc
    n_pad = n_pad_for(batch_block)

    # ---- pack the input: single zero-pad/reshape chain (replication pad is
    # ---- done in-kernel by repad()) ----------------------------------------
    xe = jnp.transpose(x_even, (0, 2, 1))                        # (B, C, L)
    xo = jnp.transpose(x_odd, (0, 2, 1))
    xs = jnp.concatenate([xe, xo], axis=1)                       # (B, 2C, L)
    if b_pad != B:
        xs = jnp.pad(xs, ((0, b_pad - B), (0, 0), (0, 0)))
    xs = xs.reshape(num_blocks, batch_block, two_c, L).transpose(0, 2, 1, 3)
    xs = jnp.pad(xs, ((0, 0), (0, 0), (0, 0), (pad_l, pad_r)))   # (nb, 2C, bb, lc)
    xs = xs.reshape(num_blocks, two_c, n_flat)
    if n_pad != n_flat:
        xs = jnp.pad(xs, ((0, 0), (0, 0), (0, n_pad - n_flat)))

    # ---- pack weights: block-diagonal pairs, im2col-flattened, pre-cast ----
    def pack_pair(pa, pb):
        w1 = jnp.zeros((two_ch, two_c, k1), jnp.float32)
        w1 = w1.at[:ch, :C].set(pa["w1"]).at[ch:, C:].set(pb["w1"])
        w1 = jnp.transpose(w1, (0, 2, 1)).reshape(two_ch, k1 * two_c)
        b1 = jnp.concatenate([pa["b1"], pb["b1"]])[:, None]
        w2 = jnp.zeros((two_c, two_ch, 3), jnp.float32)
        w2 = w2.at[:C, :ch].set(pa["w2"]).at[C:, ch:].set(pb["w2"])
        w2 = jnp.transpose(w2, (0, 2, 1)).reshape(two_c, 3 * two_ch)
        b2 = jnp.concatenate([pa["b2"], pb["b2"]])[:, None]
        return (w1.astype(matmul_dtype), b1.astype(jnp.float32),
                w2.astype(matmul_dtype), b2.astype(jnp.float32))

    w1a, b1a, w2a, b2a = pack_pair(params["phi"], params["psi"])
    w1b, b1b, w2b, b2b = pack_pair(params["U"], params["P"])
    w1_all = jnp.stack([w1a, w1b])
    b1_all = jnp.stack([b1a, b1b])
    w2_all = jnp.stack([w2a, w2b])
    b2_all = jnp.stack([b2a, b2b])

    kernel = functools.partial(
        _levelscinet_kernel, k1=k1, pad_l=pad_l, pad_r=pad_r, lc=lc,
        data_len=L, c=C)

    out = pl.pallas_call(
        kernel,
        out_shape=jax.ShapeDtypeStruct((num_blocks, two_c, n_pad), x.dtype),
        grid_spec=pltpu.PrefetchScalarGridSpec(
            num_scalar_prefetch=0,
            grid=(num_blocks,),
            in_specs=[
                pl.BlockSpec((1, two_c, n_pad), lambda g: (g, 0, 0)),
                # Grid-invariant packed weights/biases: constant index_map, so
                # they are only DMA'd once across the whole grid.
                pl.BlockSpec(w1_all.shape, lambda g: (0, 0, 0)),
                pl.BlockSpec(b1_all.shape, lambda g: (0, 0, 0)),
                pl.BlockSpec(w2_all.shape, lambda g: (0, 0, 0)),
                pl.BlockSpec(b2_all.shape, lambda g: (0, 0, 0)),
            ],
            out_specs=pl.BlockSpec((1, two_c, n_pad), lambda g: (g, 0, 0)),
        ),
        compiler_params=pltpu.CompilerParams(
            dimension_semantics=("parallel",),
            vmem_limit_bytes=64 * 1024 * 1024),
    )(xs, w1_all, b1_all, w2_all, b2_all)

    # ---- unpack lanes back to (B, C, L) per stream --------------------------
    out = out[:, :, :n_flat].reshape(num_blocks, two_c, batch_block, lc)
    out = out.transpose(0, 2, 1, 3).reshape(b_pad, two_c, lc)[:B]
    even_up = out[:, :C, pad_l:pad_l + L]
    odd_up = out[:, C:, pad_l:pad_l + L]
    if flag == 1:
        odd_up = odd_up[:, :, :-1]
    elif flag == 2:
        even_up = even_up[:, :, :-1]

    # LevelSCINet returns permuted back to (B, L, C).
    return jnp.transpose(even_up, (0, 2, 1)), jnp.transpose(odd_up, (0, 2, 1))


# ---------------------------------------------------------------------------
# Pure-JAX reference (lax.conv) for a numerical sanity check
# ---------------------------------------------------------------------------
def _ref_branch(x, p, pad_l, pad_r):
    xp = jnp.concatenate(
        [jnp.repeat(x[:, :, :1], pad_l, axis=2), x,
         jnp.repeat(x[:, :, -1:], pad_r, axis=2)], axis=2)
    h = jax.lax.conv_general_dilated(xp, p["w1"], (1,), "VALID",
                                     dimension_numbers=("NCH", "OIH", "NCH"))
    h = h + p["b1"][None, :, None]
    h = jnp.where(h > 0, h, 0.01 * h)
    y = jax.lax.conv_general_dilated(h, p["w2"], (1,), "VALID",
                                     dimension_numbers=("NCH", "OIH", "NCH"))
    return jnp.tanh(y + p["b2"][None, :, None])


def _ref_forward(x, params, kernel_size):
    pad_l, pad_r = _pad_amounts(kernel_size)
    x_even, x_odd, flag = _split_even_odd(x)
    xe = jnp.transpose(x_even, (0, 2, 1))
    xo = jnp.transpose(x_odd, (0, 2, 1))
    d = xo * jnp.exp(_ref_branch(xe, params["phi"], pad_l, pad_r))
    c = xe * jnp.exp(_ref_branch(xo, params["psi"], pad_l, pad_r))
    even_up = c + _ref_branch(d, params["U"], pad_l, pad_r)
    odd_up = d - _ref_branch(c, params["P"], pad_l, pad_r)
    if flag == 1:
        odd_up = odd_up[:, :, :-1]
    elif flag == 2:
        even_up = even_up[:, :, :-1]
    return jnp.transpose(even_up, (0, 2, 1)), jnp.transpose(odd_up, (0, 2, 1))


# ---------------------------------------------------------------------------
if __name__ == "__main__":
    B, C = 2, 4                 # batch, channels (in_planes)
    hidden_size = 2             # hidden channels = C * hidden_size = 8
    kernel_size = 5

    key = jax.random.PRNGKey(0)
    key, kx = jax.random.split(key)
    params = init_params(key, C, hidden_size, kernel_size)

    fwd_bf16 = jax.jit(functools.partial(level_scinet_forward,
                                         kernel_size=kernel_size))
    fwd_f32 = jax.jit(functools.partial(level_scinet_forward,
                                        kernel_size=kernel_size,
                                        matmul_dtype=jnp.float32))

    for T in (16, 15):          # even and odd sequence lengths
        x = jax.random.normal(jax.random.fold_in(kx, T), (B, T, C), jnp.float32)
        ref_even, ref_odd = _ref_forward(x, params, kernel_size)

        # Default bf16-MXU path (bf16-mantissa tolerance).
        even_up, odd_up = jax.block_until_ready(fwd_bf16(x, params))
        np.testing.assert_allclose(np.asarray(even_up), np.asarray(ref_even),
                                   rtol=5e-2, atol=5e-2)
        np.testing.assert_allclose(np.asarray(odd_up), np.asarray(ref_odd),
                                   rtol=5e-2, atol=5e-2)

        # f32-MXU path validates the kernel math tightly.
        even32, odd32 = jax.block_until_ready(fwd_f32(x, params))
        np.testing.assert_allclose(np.asarray(even32), np.asarray(ref_even),
                                   rtol=5e-3, atol=5e-3)
        np.testing.assert_allclose(np.asarray(odd32), np.asarray(ref_odd),
                                   rtol=5e-3, atol=5e-3)

        assert even_up.shape == (B, (T + 1) // 2, C)
        assert odd_up.shape == (B, T // 2, C)

    print("KERNEL_OK")
</pallas_src>

<mosaic_0001>
module attributes {stable_mosaic.version = 11 : i64} {
  func.func @_levelscinet_kernel(%arg0: i32, %arg1: memref<1x8x128xf32, #tpu.memory_space<vmem>>, %arg2: memref<2x16x40xbf16, #tpu.memory_space<vmem>>, %arg3: memref<2x16x1xf32, #tpu.memory_space<vmem>>, %arg4: memref<2x8x48xbf16, #tpu.memory_space<vmem>>, %arg5: memref<2x8x1xf32, #tpu.memory_space<vmem>>, %arg6: memref<1x8x128xf32, #tpu.memory_space<vmem>>) attributes {dimension_semantics = [#tpu.dimension_semantics<parallel>], iteration_bounds = array<i64: 1>, scalar_prefetch = 0 : i64, scratch_operands = 0 : i64, tpu.core_type = #tpu.core_type<tc>, window_params = [{transform_indices = @transform_0, window_bounds = array<i64: 1, 8, 128>}, {pipeline_mode = #tpu.pipeline_mode<synchronous>, transform_indices = @transform_1, window_bounds = array<i64: 2, 16, 40>}, {pipeline_mode = #tpu.pipeline_mode<synchronous>, transform_indices = @transform_2, window_bounds = array<i64: 2, 16, 1>}, {pipeline_mode = #tpu.pipeline_mode<synchronous>, transform_indices = @transform_3, window_bounds = array<i64: 2, 8, 48>}, {pipeline_mode = #tpu.pipeline_mode<synchronous>, transform_indices = @transform_4, window_bounds = array<i64: 2, 8, 1>}, {transform_indices = @transform_5, window_bounds = array<i64: 1, 8, 128>}]} {
    %0 = tpu.iota {dimensions = array<i32: 1>} : vector<8x128xi32>
    %c14_i32 = arith.constant 14 : i32
    %c0_i32 = arith.constant 0 : i32
    %1 = arith.cmpi eq, %c14_i32, %c0_i32 : i32
    %c1_i32 = arith.constant 1 : i32
    %2 = arith.select %1, %c1_i32, %c14_i32 : i32
    %3 = vector.broadcast %2 : i32 to vector<8x128xi32>
    %4 = arith.remsi %0, %3 : vector<8x128xi32>
    %c0_i32_0 = arith.constant 0 : i32
    %5 = vector.broadcast %c0_i32_0 : i32 to vector<8x128xi32>
    %6 = arith.cmpi ne, %4, %5 : vector<8x128xi32>
    %c0_i32_1 = arith.constant 0 : i32
    %7 = vector.broadcast %c0_i32_1 : i32 to vector<8x128xi32>
    %8 = arith.cmpi slt, %4, %7 : vector<8x128xi32>
    %c0_i32_2 = arith.constant 0 : i32
    %9 = arith.cmpi slt, %2, %c0_i32_2 : i32
    %10 = vector.broadcast %9 : i1 to vector<8x128xi1>
    %11 = vector.broadcast %10 : vector<8x128xi1> to vector<8x128xi1>
    %12 = arith.xori %8, %11 : vector<8x128xi1>
    %13 = arith.andi %12, %6 : vector<8x128xi1>
    %14 = vector.broadcast %2 : i32 to vector<8x128xi32>
    %15 = arith.addi %4, %14 : vector<8x128xi32>
    %16 = arith.select %13, %15, %4 : vector<8x128xi1>, vector<8x128xi32>
    %c3_i32 = arith.constant 3 : i32
    %17 = vector.broadcast %c3_i32 : i32 to vector<8x128xi32>
    %18 = arith.cmpi slt, %16, %17 : vector<8x128xi32>
    %c11_i32 = arith.constant 11 : i32
    %19 = vector.broadcast %c11_i32 : i32 to vector<8x128xi32>
    %20 = arith.cmpi sge, %16, %19 : vector<8x128xi32>
    %c0 = arith.constant 0 : index
    %c0_3 = arith.constant 0 : index
    %c0_4 = arith.constant 0 : index
    %21 = vector.load %arg1[%c0, %c0_3, %c0_4] : memref<1x8x128xf32, #tpu.memory_space<vmem>>, vector<1x8x128xf32>
    %22 = vector.shape_cast %21 : vector<1x8x128xf32> to vector<8x128xf32>
    %c127_i32 = arith.constant 127 : i32
    %23 = tpu.dynamic_rotate %22 by %c127_i32 dim 1 : vector<8x128xf32>, i32 -> vector<8x128xf32>
    %c1_i32_5 = arith.constant 1 : i32
    %24 = tpu.dynamic_rotate %22 by %c1_i32_5 dim 1 : vector<8x128xf32>, i32 -> vector<8x128xf32>
    %25 = arith.select %20, %24, %22 : vector<8x128xi1>, vector<8x128xf32>
    %26 = arith.select %18, %23, %25 : vector<8x128xi1>, vector<8x128xf32>
    %c127_i32_6 = arith.constant 127 : i32
    %27 = tpu.dynamic_rotate %26 by %c127_i32_6 dim 1 : vector<8x128xf32>, i32 -> vector<8x128xf32>
    %c1_i32_7 = arith.constant 1 : i32
    %28 = tpu.dynamic_rotate %26 by %c1_i32_7 dim 1 : vector<8x128xf32>, i32 -> vector<8x128xf32>
    %29 = arith.select %20, %28, %26 : vector<8x128xi1>, vector<8x128xf32>
    %30 = arith.select %18, %27, %29 : vector<8x128xi1>, vector<8x128xf32>
    %c127_i32_8 = arith.constant 127 : i32
    %31 = tpu.dynamic_rotate %30 by %c127_i32_8 dim 1 : vector<8x128xf32>, i32 -> vector<8x128xf32>
    %c1_i32_9 = arith.constant 1 : i32
    %32 = tpu.dynamic_rotate %30 by %c1_i32_9 dim 1 : vector<8x128xf32>, i32 -> vector<8x128xf32>
    %33 = arith.select %20, %32, %30 : vector<8x128xi1>, vector<8x128xf32>
    %34 = arith.select %18, %31, %33 : vector<8x128xi1>, vector<8x128xf32>
    %c0_10 = arith.constant 0 : index
    %c0_11 = arith.constant 0 : index
    %c0_12 = arith.constant 0 : index
    %35 = vector.load %arg2[%c0_10, %c0_11, %c0_12] : memref<2x16x40xbf16, #tpu.memory_space<vmem>>, vector<1x16x40xbf16>
    %36 = vector.shape_cast %35 : vector<1x16x40xbf16> to vector<16x40xbf16>
    %c0_13 = arith.constant 0 : index
    %c0_14 = arith.constant 0 : index
    %c0_15 = arith.constant 0 : index
    %37 = vector.load %arg3[%c0_13, %c0_14, %c0_15] : memref<2x16x1xf32, #tpu.memory_space<vmem>>, vector<1x16x1xf32>
    %38 = vector.shape_cast %37 : vector<1x16x1xf32> to vector<16x1xf32>
    %c0_16 = arith.constant 0 : index
    %c0_17 = arith.constant 0 : index
    %c0_18 = arith.constant 0 : index
    %39 = vector.load %arg4[%c0_16, %c0_17, %c0_18] : memref<2x8x48xbf16, #tpu.memory_space<vmem>>, vector<1x8x48xbf16>
    %40 = vector.shape_cast %39 : vector<1x8x48xbf16> to vector<8x48xbf16>
    %c0_19 = arith.constant 0 : index
    %c0_20 = arith.constant 0 : index
    %c0_21 = arith.constant 0 : index
    %41 = vector.load %arg5[%c0_19, %c0_20, %c0_21] : memref<2x8x1xf32, #tpu.memory_space<vmem>>, vector<1x8x1xf32>
    %42 = vector.shape_cast %41 : vector<1x8x1xf32> to vector<8x1xf32>
    %c127_i32_22 = arith.constant 127 : i32
    %43 = tpu.dynamic_rotate %34 by %c127_i32_22 dim 1 : vector<8x128xf32>, i32 -> vector<8x128xf32>
    %c126_i32 = arith.constant 126 : i32
    %44 = tpu.dynamic_rotate %34 by %c126_i32 dim 1 : vector<8x128xf32>, i32 -> vector<8x128xf32>
    %c125_i32 = arith.constant 125 : i32
    %45 = tpu.dynamic_rotate %34 by %c125_i32 dim 1 : vector<8x128xf32>, i32 -> vector<8x128xf32>
    %c124_i32 = arith.constant 124 : i32
    %46 = tpu.dynamic_rotate %34 by %c124_i32 dim 1 : vector<8x128xf32>, i32 -> vector<8x128xf32>
    %47 = tpu.concatenate %34, %43, %44, %45, %46 in 0 : vector<8x128xf32>, vector<8x128xf32>, vector<8x128xf32>, vector<8x128xf32>, vector<8x128xf32> -> vector<40x128xf32>
    %48 = arith.truncf %47 : vector<40x128xf32> to vector<40x128xbf16>
    %cst = arith.constant dense<0.000000e+00> : vector<16x128xf32>
    %49 = tpu.matmul %36, %48, %cst {dimension_numbers = #tpu.dot_dimension_numbers<[1], [0], [0], [1], [0, 0, 1, 1], [], []>} : vector<16x40xbf16>, vector<40x128xbf16>, vector<16x128xf32> -> vector<16x128xf32>
    %50 = vector.broadcast %38 : vector<16x1xf32> to vector<16x128xf32>
    %51 = arith.addf %49, %50 : vector<16x128xf32>
    %cst_23 = arith.constant 0.00999999977 : f32
    %52 = vector.broadcast %cst_23 : f32 to vector<16x128xf32>
    %53 = arith.mulf %52, %51 : vector<16x128xf32>
    %54 = arith.maximumf %51, %53 : vector<16x128xf32>
    %c127_i32_24 = arith.constant 127 : i32
    %55 = tpu.dynamic_rotate %54 by %c127_i32_24 dim 1 : vector<16x128xf32>, i32 -> vector<16x128xf32>
    %c126_i32_25 = arith.constant 126 : i32
    %56 = tpu.dynamic_rotate %54 by %c126_i32_25 dim 1 : vector<16x128xf32>, i32 -> vector<16x128xf32>
    %57 = tpu.concatenate %54, %55, %56 in 0 : vector<16x128xf32>, vector<16x128xf32>, vector<16x128xf32> -> vector<48x128xf32>
    %58 = arith.truncf %57 : vector<48x128xf32> to vector<48x128xbf16>
    %cst_26 = arith.constant dense<0.000000e+00> : vector<8x128xf32>
    %59 = tpu.matmul %40, %58, %cst_26 {dimension_numbers = #tpu.dot_dimension_numbers<[1], [0], [0], [1], [0, 0, 1, 1], [], []>} : vector<8x48xbf16>, vector<48x128xbf16>, vector<8x128xf32> -> vector<8x128xf32>
    %60 = vector.broadcast %42 : vector<8x1xf32> to vector<8x128xf32>
    %61 = arith.addf %59, %60 : vector<8x128xf32>
    %62 = math.tanh %61 : vector<8x128xf32>
    %c3_i32_27 = arith.constant 3 : i32
    %63 = tpu.dynamic_rotate %62 by %c3_i32_27 dim 1 : vector<8x128xf32>, i32 -> vector<8x128xf32>
    %64 = vector.extract_strided_slice %34 {offsets = [4, 0], sizes = [4, 128], strides = [1, 1]} : vector<8x128xf32> to vector<4x128xf32>
    %65 = vector.extract_strided_slice %63 {offsets = [0, 0], sizes = [4, 128], strides = [1, 1]} : vector<8x128xf32> to vector<4x128xf32>
    %66 = math.exp %65 : vector<4x128xf32>
    %67 = arith.mulf %64, %66 : vector<4x128xf32>
    %68 = vector.extract_strided_slice %34 {offsets = [0, 0], sizes = [4, 128], strides = [1, 1]} : vector<8x128xf32> to vector<4x128xf32>
    %69 = vector.extract_strided_slice %63 {offsets = [4, 0], sizes = [4, 128], strides = [1, 1]} : vector<8x128xf32> to vector<4x128xf32>
    %70 = math.exp %69 : vector<4x128xf32>
    %71 = arith.mulf %68, %70 : vector<4x128xf32>
    %72 = tpu.concatenate %67, %71 in 0 : vector<4x128xf32>, vector<4x128xf32> -> vector<8x128xf32>
    %c127_i32_28 = arith.constant 127 : i32
    %73 = tpu.dynamic_rotate %72 by %c127_i32_28 dim 1 : vector<8x128xf32>, i32 -> vector<8x128xf32>
    %c1_i32_29 = arith.constant 1 : i32
    %74 = tpu.dynamic_rotate %72 by %c1_i32_29 dim 1 : vector<8x128xf32>, i32 -> vector<8x128xf32>
    %75 = arith.select %20, %74, %72 : vector<8x128xi1>, vector<8x128xf32>
    %76 = arith.select %18, %73, %75 : vector<8x128xi1>, vector<8x128xf32>
    %c127_i32_30 = arith.constant 127 : i32
    %77 = tpu.dynamic_rotate %76 by %c127_i32_30 dim 1 : vector<8x128xf32>, i32 -> vector<8x128xf32>
    %c1_i32_31 = arith.constant 1 : i32
    %78 = tpu.dynamic_rotate %76 by %c1_i32_31 dim 1 : vector<8x128xf32>, i32 -> vector<8x128xf32>
    %79 = arith.select %20, %78, %76 : vector<8x128xi1>, vector<8x128xf32>
    %80 = arith.select %18, %77, %79 : vector<8x128xi1>, vector<8x128xf32>
    %c127_i32_32 = arith.constant 127 : i32
    %81 = tpu.dynamic_rotate %80 by %c127_i32_32 dim 1 : vector<8x128xf32>, i32 -> vector<8x128xf32>
    %c1_i32_33 = arith.constant 1 : i32
    %82 = tpu.dynamic_rotate %80 by %c1_i32_33 dim 1 : vector<8x128xf32>, i32 -> vector<8x128xf32>
    %83 = arith.select %20, %82, %80 : vector<8x128xi1>, vector<8x128xf32>
    %84 = arith.select %18, %81, %83 : vector<8x128xi1>, vector<8x128xf32>
    %c1 = arith.constant 1 : index
    %c0_34 = arith.constant 0 : index
    %c0_35 = arith.constant 0 : index
    %85 = vector.load %arg2[%c1, %c0_34, %c0_35] : memref<2x16x40xbf16, #tpu.memory_space<vmem>>, vector<1x16x40xbf16>
    %86 = vector.shape_cast %85 : vector<1x16x40xbf16> to vector<16x40xbf16>
    %c1_36 = arith.constant 1 : index
    %c0_37 = arith.constant 0 : index
    %c0_38 = arith.constant 0 : index
    %87 = vector.load %arg3[%c1_36, %c0_37, %c0_38] : memref<2x16x1xf32, #tpu.memory_space<vmem>>, vector<1x16x1xf32>
    %88 = vector.shape_cast %87 : vector<1x16x1xf32> to vector<16x1xf32>
    %c1_39 = arith.constant 1 : index
    %c0_40 = arith.constant 0 : index
    %c0_41 = arith.constant 0 : index
    %89 = vector.load %arg4[%c1_39, %c0_40, %c0_41] : memref<2x8x48xbf16, #tpu.memory_space<vmem>>, vector<1x8x48xbf16>
    %90 = vector.shape_cast %89 : vector<1x8x48xbf16> to vector<8x48xbf16>
    %c1_42 = arith.constant 1 : index
    %c0_43 = arith.constant 0 : index
    %c0_44 = arith.constant 0 : index
    %91 = vector.load %arg5[%c1_42, %c0_43, %c0_44] : memref<2x8x1xf32, #tpu.memory_space<vmem>>, vector<1x8x1xf32>
    %92 = vector.shape_cast %91 : vector<1x8x1xf32> to vector<8x1xf32>
    %c127_i32_45 = arith.constant 127 : i32
    %93 = tpu.dynamic_rotate %84 by %c127_i32_45 dim 1 : vector<8x128xf32>, i32 -> vector<8x128xf32>
    %c126_i32_46 = arith.constant 126 : i32
    %94 = tpu.dynamic_rotate %84 by %c126_i32_46 dim 1 : vector<8x128xf32>, i32 -> vector<8x128xf32>
    %c125_i32_47 = arith.constant 125 : i32
    %95 = tpu.dynamic_rotate %84 by %c125_i32_47 dim 1 : vector<8x128xf32>, i32 -> vector<8x128xf32>
    %c124_i32_48 = arith.constant 124 : i32
    %96 = tpu.dynamic_rotate %84 by %c124_i32_48 dim 1 : vector<8x128xf32>, i32 -> vector<8x128xf32>
    %97 = tpu.concatenate %84, %93, %94, %95, %96 in 0 : vector<8x128xf32>, vector<8x128xf32>, vector<8x128xf32>, vector<8x128xf32>, vector<8x128xf32> -> vector<40x128xf32>
    %98 = arith.truncf %97 : vector<40x128xf32> to vector<40x128xbf16>
    %cst_49 = arith.constant dense<0.000000e+00> : vector<16x128xf32>
    %99 = tpu.matmul %86, %98, %cst_49 {dimension_numbers = #tpu.dot_dimension_numbers<[1], [0], [0], [1], [0, 0, 1, 1], [], []>} : vector<16x40xbf16>, vector<40x128xbf16>, vector<16x128xf32> -> vector<16x128xf32>
    %100 = vector.broadcast %88 : vector<16x1xf32> to vector<16x128xf32>
    %101 = arith.addf %99, %100 : vector<16x128xf32>
    %cst_50 = arith.constant 0.00999999977 : f32
    %102 = vector.broadcast %cst_50 : f32 to vector<16x128xf32>
    %103 = arith.mulf %102, %101 : vector<16x128xf32>
    %104 = arith.maximumf %101, %103 : vector<16x128xf32>
    %c127_i32_51 = arith.constant 127 : i32
    %105 = tpu.dynamic_rotate %104 by %c127_i32_51 dim 1 : vector<16x128xf32>, i32 -> vector<16x128xf32>
    %c126_i32_52 = arith.constant 126 : i32
    %106 = tpu.dynamic_rotate %104 by %c126_i32_52 dim 1 : vector<16x128xf32>, i32 -> vector<16x128xf32>
    %107 = tpu.concatenate %104, %105, %106 in 0 : vector<16x128xf32>, vector<16x128xf32>, vector<16x128xf32> -> vector<48x128xf32>
    %108 = arith.truncf %107 : vector<48x128xf32> to vector<48x128xbf16>
    %cst_53 = arith.constant dense<0.000000e+00> : vector<8x128xf32>
    %109 = tpu.matmul %90, %108, %cst_53 {dimension_numbers = #tpu.dot_dimension_numbers<[1], [0], [0], [1], [0, 0, 1, 1], [], []>} : vector<8x48xbf16>, vector<48x128xbf16>, vector<8x128xf32> -> vector<8x128xf32>
    %110 = vector.broadcast %92 : vector<8x1xf32> to vector<8x128xf32>
    %111 = arith.addf %109, %110 : vector<8x128xf32>
    %112 = math.tanh %111 : vector<8x128xf32>
    %c3_i32_54 = arith.constant 3 : i32
    %113 = tpu.dynamic_rotate %112 by %c3_i32_54 dim 1 : vector<8x128xf32>, i32 -> vector<8x128xf32>
    %114 = vector.extract_strided_slice %84 {offsets = [4, 0], sizes = [4, 128], strides = [1, 1]} : vector<8x128xf32> to vector<4x128xf32>
    %115 = vector.extract_strided_slice %113 {offsets = [0, 0], sizes = [4, 128], strides = [1, 1]} : vector<8x128xf32> to vector<4x128xf32>
    %116 = arith.addf %114, %115 : vector<4x128xf32>
    %117 = vector.extract_strided_slice %84 {offsets = [0, 0], sizes = [4, 128], strides = [1, 1]} : vector<8x128xf32> to vector<4x128xf32>
    %118 = vector.extract_strided_slice %113 {offsets = [4, 0], sizes = [4, 128], strides = [1, 1]} : vector<8x128xf32> to vector<4x128xf32>
    %119 = arith.subf %117, %118 : vector<4x128xf32>
    %120 = tpu.concatenate %116, %119 in 0 : vector<4x128xf32>, vector<4x128xf32> -> vector<8x128xf32>
    %c0_55 = arith.constant 0 : index
    %c0_56 = arith.constant 0 : index
    %c0_57 = arith.constant 0 : index
    %121 = vector.load %arg6[%c0_55, %c0_56, %c0_57] : memref<1x8x128xf32, #tpu.memory_space<vmem>>, vector<1x8x128xf32>
    %122 = vector.shape_cast %121 : vector<1x8x128xf32> to vector<8x128xf32>
    %123 = vector.shape_cast %120 : vector<8x128xf32> to vector<1x8x128xf32>
    tpu.vector_store %arg6[%c0_55, %c0_56, %c0_57], %123 {strides = array<i32>} : memref<1x8x128xf32, #tpu.memory_space<vmem>>, vector<1x8x128xf32>,
    return
  }
  func.func @transform_0(%arg0: i32) -> (i32, i32, i32) {
    %c0_i32 = arith.constant 0 : i32
    %c0_i32_0 = arith.constant 0 : i32
    %c0_i32_1 = arith.constant 0 : i32
    return %arg0, %c0_i32, %c0_i32_0 : i32, i32, i32
  }
  func.func @transform_1(%arg0: i32) -> (i32, i32, i32) {
    %c0_i32 = arith.constant 0 : i32
    %c0_i32_0 = arith.constant 0 : i32
    %c0_i32_1 = arith.constant 0 : i32
    %c0_i32_2 = arith.constant 0 : i32
    return %c0_i32, %c0_i32_0, %c0_i32_1 : i32, i32, i32
  }
  func.func @transform_2(%arg0: i32) -> (i32, i32, i32) {
    %c0_i32 = arith.constant 0 : i32
    %c0_i32_0 = arith.constant 0 : i32
    %c0_i32_1 = arith.constant 0 : i32
    %c0_i32_2 = arith.constant 0 : i32
    return %c0_i32, %c0_i32_0, %c0_i32_1 : i32, i32, i32
  }
  func.func @transform_3(%arg0: i32) -> (i32, i32, i32) {
    %c0_i32 = arith.constant 0 : i32
    %c0_i32_0 = arith.constant 0 : i32
    %c0_i32_1 = arith.constant 0 : i32
    %c0_i32_2 = arith.constant 0 : i32
    return %c0_i32, %c0_i32_0, %c0_i32_1 : i32, i32, i32
  }
  func.func @transform_4(%arg0: i32) -> (i32, i32, i32) {
    %c0_i32 = arith.constant 0 : i32
    %c0_i32_0 = arith.constant 0 : i32
    %c0_i32_1 = arith.constant 0 : i32
    %c0_i32_2 = arith.constant 0 : i32
    return %c0_i32, %c0_i32_0, %c0_i32_1 : i32, i32, i32
  }
  func.func @transform_5(%arg0: i32) -> (i32, i32, i32) {
    %c0_i32 = arith.constant 0 : i32
    %c0_i32_0 = arith.constant 0 : i32
    %c0_i32_1 = arith.constant 0 : i32
    return %arg0, %c0_i32, %c0_i32_0 : i32, i32, i32
  }
}

</mosaic_0001>

<bundles_post_ra>
// kernel: level_scinet_forward.1
= control target key start
LH: loop header
LB: loop body
LE: loop exit
PB: predicated region body
PF: predicated region fallthrough
CT: control target
= control target key end

     0   :  { %10 = vsyncpa [#allocation3], 0  ;;  %s961_s0 = inlined_call_operand.hbm [shape: f32[1,8,128], index: 0, kind: input, shape index: {}]   ;;  %s962_s1 = inlined_call_operand.hbm [shape: bf16[2,16,40], index: 1, kind: input, shape index: {}]   ;;  %s963_s2 = inlined_call_operand.hbm [shape: f32[2,16,1], index: 2, kind: input, shape index: {}]   ;;  %s964_s3 = inlined_call_operand.hbm [shape: bf16[2,8,48], index: 3, kind: input, shape index: {}]   ;;  %s965_s4 = inlined_call_operand.hbm [shape: f32[2,8,1], index: 4, kind: input, shape index: {}]   ;;  %s966_s5 = inlined_call_operand.hbm [shape: f32[1,8,128], index: 5, kind: output, shape index: {}]  }
   0x1   :  { %11 = vsyncpa [#allocation6], 0 }
   0x2   :  { %12 = vsyncpa [#allocation9], 0 }
   0x3   :  { %13 = vsyncpa [#allocation4], 0  ;;  %s738_s18 = smov [#allocation5]   ;;  %s598_s22 = scalar_lea.hbm %s962_s1, 256 }
   0x4   :  { %s29_s19 = sshll.u32 %s738_s18, 4  ;;  %p599_p0 = scmp.ne.s32.totalorder %s962_s1, %s598_s22  ;;  %s30_s19 = int_to_ptr.vmem [resolvable:$true] %s29_s19 }
   0x5   :  { %p602_p1 = scmp.lt.u32.totalorder %s598_s22, %s962_s1 }
   0x7   :  { %p604_p2 = pnand %p602_p1, %p599_p0 }
   0x9   :  { %607 = shalt.err (!%p604_p2)
}
   0xa   :  { %s608_s27 = scalar_lea.vmem %s30_s19, 256  ;;  %p613_p4 = scmp.lt.s32.totalorder %s30_s19, %s30_s19 }
   0xb   :  { %p609_p3 = scmp.ne.s32.totalorder %s30_s19, %s608_s27  ;;  %p614_p5 = scmp.lt.s32.totalorder %s608_s27, %s608_s27 }
   0xd   :  { %p615_p6 = por %p614_p5, %p613_p4 }
   0xf   :  { %p616_p7 = pnand %p615_p6, %p609_p3 }
  0x11   :  { %619 = shalt.err (!%p616_p7)
}
  0x12   :  { %s739_s28 = smov 64   ;;  %s740_s29 = smov 4  }
  0x13   :  { %35 = dma.hbm_to_vmem [thread:$0]  %s962_s1, 256, %s30_s19, [#allocation6], %s739_s28, %s739_s28, %s740_s29  }
  0x14   :  { %s741_s7 = smov [#allocation8]   ;;  %s742_s9 = smov [#allocation2]  }
  0x15   :  { %s53_s8 = sshll.u32 %s741_s7, 4  ;;  %s20_s10 = sshll.u32 %s742_s9, 4  ;;  %s54_s8 = int_to_ptr.vmem [resolvable:$true] %s53_s8  ;;  %s21_s10 = int_to_ptr.vmem [resolvable:$true] %s20_s10 }
  0x16   :  { %s620_s13 = scalar_lea.hbm %s964_s3, 128 }
  0x17   :  { %p621_p8 = scmp.ne.s32.totalorder %s964_s3, %s620_s13  ;;  %p624_p9 = scmp.lt.u32.totalorder %s620_s13, %s964_s3 }
  0x19   :  { %p626_p10 = pnand %p624_p9, %p621_p8 }
  0x1b   :  { %629 = shalt.err (!%p626_p10)
}
  0x1c   :  { %s630_s1 = scalar_lea.vmem %s54_s8, 128  ;;  %p635_p12 = scmp.lt.s32.totalorder %s54_s8, %s54_s8 }
  0x1d   :  { %p631_p11 = scmp.ne.s32.totalorder %s54_s8, %s630_s1  ;;  %p636_p13 = scmp.lt.s32.totalorder %s630_s1, %s630_s1 }
  0x1f   :  { %p637_p0 = por %p636_p13, %p635_p12 }
  0x21   :  { %p638_p1 = pnand %p637_p0, %p631_p11 }
  0x23   :  { %641 = shalt.err (!%p638_p1)
}
  0x24   :  { %59 = dma.hbm_to_vmem [thread:$0]  %s964_s3, 128, %s54_s8, [#allocation9], %s739_s28, %s739_s28, %s740_s29  }
  0x25   :  { %s642_s22 = scalar_lea.hbm %s961_s0, 128 }
  0x26   :  { %p643_p2 = scmp.ne.s32.totalorder %s961_s0, %s642_s22  ;;  %p646_p3 = scmp.lt.u32.totalorder %s642_s22, %s961_s0 }
  0x28   :  { %p648_p4 = pnand %p646_p3, %p643_p2 }
  0x2a   :  { %651 = shalt.err (!%p648_p4)
}
  0x2b   :  { %s652_s27 = scalar_lea.vmem %s21_s10, 128  ;;  %p657_p6 = scmp.lt.s32.totalorder %s21_s10, %s21_s10 }
  0x2c   :  { %p653_p5 = scmp.ne.s32.totalorder %s21_s10, %s652_s27  ;;  %p658_p7 = scmp.lt.s32.totalorder %s652_s27, %s652_s27 }
  0x2e   :  { %p659_p8 = por %p658_p7, %p657_p6 }
  0x30   :  { %p660_p9 = pnand %p659_p8, %p653_p5 }
  0x32   :  { %663 = shalt.err (!%p660_p9)
}
  0x33   :  { %23 = dma.hbm_to_vmem [thread:$0]  %s961_s0, 128, %s21_s10, [#allocation3]  }
  0x34   :  { %s743_s29 = smov [#allocation7]   ;;  %s664_s8 = scalar_lea.hbm %s963_s2, 512 }
  0x35   :  { %s41_s30 = sshll.u32 %s743_s29, 4  ;;  %p665_p10 = scmp.ne.s32.totalorder %s963_s2, %s664_s8  ;;  %s42_s30 = int_to_ptr.vmem [resolvable:$true] %s41_s30 }
  0x36   :  { %p668_p11 = scmp.lt.u32.totalorder %s664_s8, %s963_s2 }
  0x38   :  { %p670_p12 = pnand %p668_p11, %p665_p10 }
  0x3a   :  { %673 = shalt.err (!%p670_p12)
}
  0x3b   :  { %s674_s14 = scalar_lea.vmem %s42_s30, 512  ;;  %p679_p0 = scmp.lt.s32.totalorder %s42_s30, %s42_s30 }
  0x3c   :  { %p675_p13 = scmp.ne.s32.totalorder %s42_s30, %s674_s14  ;;  %p680_p1 = scmp.lt.s32.totalorder %s674_s14, %s674_s14 }
  0x3e   :  { %p681_p2 = por %p680_p1, %p679_p0 }
  0x40   :  { %p682_p3 = pnand %p681_p2, %p675_p13 }
  0x42   :  { %685 = shalt.err (!%p682_p3)
}
  0x43   :  { %s744_s0 = smov 128   ;;  %s745_s10 = smov 8  }
  0x44   :  { %47 = dma.hbm_to_vmem [thread:$0]  %s963_s2, 512, %s42_s30, [#allocation6], %s744_s0, %s744_s0, %s745_s10  }
  0x45   :  { %s746_s17 = smov [#allocation10]   ;;  %s686_s20 = scalar_lea.hbm %s965_s4, 256 }
  0x46   :  { %s65_s1 = sshll.u32 %s746_s17, 4  ;;  %p687_p4 = scmp.ne.s32.totalorder %s965_s4, %s686_s20  ;;  %s66_s1 = int_to_ptr.vmem [resolvable:$true] %s65_s1 }
  0x47   :  { %p690_p5 = scmp.lt.u32.totalorder %s686_s20, %s965_s4 }
  0x49   :  { %p692_p6 = pnand %p690_p5, %p687_p4 }
  0x4b   :  { %695 = shalt.err (!%p692_p6)
}
  0x4c   :  { %s696_s25 = scalar_lea.vmem %s66_s1, 256  ;;  %p701_p8 = scmp.lt.s32.totalorder %s66_s1, %s66_s1 }
  0x4d   :  { %p697_p7 = scmp.ne.s32.totalorder %s66_s1, %s696_s25  ;;  %p702_p9 = scmp.lt.s32.totalorder %s696_s25, %s696_s25 }
  0x4f   :  { %p703_p10 = por %p702_p9, %p701_p8 }
  0x51   :  { %p704_p11 = pnand %p703_p10, %p697_p7 }
  0x53   :  { %707 = shalt.err (!%p704_p11)
}
  0x54   :  { %71 = dma.hbm_to_vmem [thread:$0]  %s965_s4, 256, %s66_s1, [#allocation9], %s744_s0, %s744_s0, %s745_s10  }
  0x55   :  { %730 = dma.done.wait [#allocation3], 128  }
  0x56   :  { %731 = vsyncadd [#allocation3], 4294967168 }
  0x57   :  { %732 = dma.done.wait [#allocation6], 768  }
  0x58   :  { %733 = vsyncadd [#allocation6], 4294966528 }
  0x59   :  { %734 = dma.done.wait [#allocation9], 384  }
  0x5a   :  { %735 = vsyncadd [#allocation9], 4294966912  ;;  %v747_v0 = vmov 0   ;;  %v111_v1 = vld [vmem:[#allocation2] sm:$0xff]  ;;  %s748_s27 = smov 1   ;;  %s749_s3 = smov 127   ;;  %v88_v2 = vlaneseq }
  0x5b   :  { %568 = vset.pattern.permute.xlu0 %v747_v0  ;;  %569 = vset.pattern.permute.xlu1 %v747_v0  ;;  %v750_v21 = vmov 0.0   ;;  %vm751_vm6 = vmmov 0   ;;  %s752_s4 = smov 126   ;;  %s753_s28 = smov 124   ;;  %v132_v26 = vld [vmem:[#allocation7] sm:$0xff]  ;;  %v133_v27 = vld [vmem:[#allocation7 + $0x8] sm:$0xff] }
  0x5c   :  { %114 = vrot.lane.b32.xlu0 %v111_v1, %s748_s27  ;;  %v89_v3 = vand.u32 127, %v88_v2  ;;  %507 = vmatprep.subr.bf16.mxu0 %v750_v21  ;;  %s754_s29 = smov 125   ;;  %vm166_vm7 = vcmask 1043456   ;;  %v590_v36 = vld [vmem:[#allocation5] sm:$0xff]   ;;  %vm162_vm8 = vcmask 326656   ;;  %v135_v51 = vld [vmem:[#allocation10] sm:$0xff] }
  0x5d   :  { %517 = vmatprep.subr.bf16.mxu1 %v750_v21  ;;  %513 = vmatprep.mubr.msk.bf16.mxu0 %vm751_vm6, %v750_v21  ;;  %v134_v60 = vld [vmem:[#allocation8] sm:$0xf]  ;;  %vm231_vm9 = vcmask 392192   ;;  %s755_s30 = smov 3   ;;  %s756_s6 = smov [#allocation11]  }
  0x5e   :  { %v849_v4 = vmul.u32.u64.low 2454267026, %v89_v3  ;;  %v850_v5 = vmul.u32.u64.high 2454267026, %v89_v3, %v849_v4  ;;  %523 = vmatprep.mubr.msk.bf16.mxu1 %vm751_vm6, %v750_v21  ;;  %s474_s7 = sshll.u32 %s756_s6, 4  ;;  %s475_s7 = int_to_ptr.vmem [resolvable:$true] %s474_s7 }
  0x5f   :  { %s708_s8 = scalar_lea.vmem %s475_s7, 128  ;;  %p713_p13 = scmp.lt.s32.totalorder %s475_s7, %s475_s7 }
  0x60   :  { %112 = vrot.lane.b32.xlu0 %v111_v1, %s749_s3  ;;  %vm96_vm0 = vc.u32 %v849_v4, 2454267026  ;;  %p709_p12 = scmp.ne.s32.totalorder %s475_s7, %s708_s8  ;;  %p714_p0 = scmp.lt.s32.totalorder %s708_s8, %s708_s8 }
  0x61   :  { %v97_v6 = vsel %vm96_vm0, 1, %v747_v0 }
  0x62   :  { %v98_v7 = vadd.s32 %v850_v5, %v97_v6  ;;  %p715_p1 = por %p714_p0, %p713_p13 }
  0x64   :  { %v99_v8 = vshrl.u32 %v98_v7, 3  ;;  %p716_p2 = pnand %p715_p1, %p709_p12 }
  0x66   :  { %v100_v9 = vmul.u32 14, %v99_v8 }
  0x68   :  { %v101_v10 = vsub.s32 %v89_v3, %v100_v9 }
  0x6a   :  { %vm104_vm1 = vcmp.ne.s32.totalorder %v101_v10, 0  ;;  %vm105_vm2 = vcmp.lt.s32.totalorder %v101_v10, 0  ;;  %v107_v11 = vadd.s32 14, %v101_v10 }
  0x6b   :  { %vm106_vm3 = vmand %vm105_vm2, %vm104_vm1 }
  0x6c   :  { %v853_v12 = vsel %vm106_vm3, %v107_v11, %v101_v10 }
  0x6d   :  { %vm110_vm4 = vcmp.ge.s32.totalorder %v853_v12, 11  ;;  %vm109_vm5 = vcmp.lt.s32.totalorder %v853_v12, 3 }
  0xce   :  { %v115_v13 = vpop.permute.xlu0 %114 }
  0xcf   :  { %v116_v14 = vsel %vm110_vm4, %v115_v13, %v111_v1 }
  0xd2   :  { %v113_v15 = vpop.permute.xlu0 %112 }
  0xd3   :  { %v117_v16 = vsel %vm109_vm5, %v113_v15, %v116_v14 }
  0xd4   :  { %120 = vrot.lane.b32.xlu1 %v117_v16, %s748_s27 }
  0xd8   :  { %118 = vrot.lane.b32.xlu1 %v117_v16, %s749_s3 }
 0x146   :  { %v121_v17 = vpop.permute.xlu1 %120 }
 0x147   :  { %v122_v18 = vsel %vm110_vm4, %v121_v17, %v117_v16 }
 0x14a   :  { %v119_v19 = vpop.permute.xlu1 %118 }
 0x14b   :  { %v123_v20 = vsel %vm109_vm5, %v119_v19, %v122_v18 }
 0x14c   :  { %124 = vrot.lane.b32.xlu1 %v123_v20, %s749_s3  ;;  %126 = vrot.lane.b32.xlu0 %v123_v20, %s748_s27 }
 0x1be   :  { %v125_v22 = vpop.permute.xlu1 %124  ;;  %v127_v23 = vpop.permute.xlu0 %126 }
 0x1bf   :  { %v128_v24 = vsel %vm110_vm4, %v127_v23, %v123_v20 }
 0x1c0   :  { %v879_v25 = vsel %vm109_vm5, %v125_v22, %v128_v24  ;;  %v311_v24 = vld [vmem:[#allocation7 + $0x18] sm:$0xff] }
 0x1c1   :  { %138 = vrot.lane.b32.xlu1 %v879_v25, %s752_s4  ;;  %136 = vrot.lane.b32.xlu0 %v879_v25, %s749_s3 }
 0x1c5   :  { %142 = vrot.lane.b32.xlu1 %v879_v25, %s753_s28  ;;  %140 = vrot.lane.b32.xlu0 %v879_v25, %s754_s29 }
 0x1c9   :  { %149 = vperm.xlu0 %568, %v132_v26   ;;  %154 = vperm.xlu1 %569, %v133_v27  }
 0x233   :  { %v139_v28 = vpop.permute.xlu1 %138  ;;  %v137_v29 = vpop.permute.xlu0 %136 }
 0x234   :  { %v144_v30 = vpack.c.bf16 %v137_v29, %v879_v25 }
 0x236   :  { %508 = vmatpush3.bf16.msra.mxu0 %v144_v30 }
 0x237   :  { %v143_v31 = vpop.permute.xlu1 %142  ;;  %v141_v32 = vpop.permute.xlu0 %140  ;;  %509 = vmatprep.subr.bf16.mxu0 %v750_v21 }
 0x238   :  { %v145_v33 = vpack.c.bf16 %v141_v32, %v139_v28  ;;  %v146_v34 = vpack.c.bf16 %v143_v31, %v143_v31 }
 0x23a   :  { %510 = vmatpush3.bf16.msra.mxu0 %v145_v33  ;;  %v168_v35 = vsel %vm166_vm7, %v146_v34, 0  ;;  %v591_v33 = vld [vmem:[#allocation5 + $0x8] sm:$0xff]  }
 0x23b   :  { %511 = vmatprep.subr.bf16.mxu0 %v750_v21 }
 0x23e   :  { %512 = vmatpush3.bf16.msra.mxu0 %v168_v35 }
 0x23f   :  { %527 = vmatprep.subr.bf16.mxu0 %v750_v21 }
 0x241   :  { %514 = vmatmul.mubr.msk.bf16.vlgmr.msra.gmra.mrb[0].mxu0 %vm162_vm8, %v590_v36 }
 0x242   :  { %533 = vmatprep.mubr.msk.bf16.mxu0 %vm751_vm6, %v750_v21 }
 0x248   :  { %v150_v37 = vpop.permute.xlu0 %149  ;;  %v155_v39 = vpop.permute.xlu1 %154 }
 0x314   :  { %v204_v38 = vpop.f32.mrb[0].mxu0 }
 0x315   :  { %v205_v40 = vadd.f32 %v204_v38, %v150_v37  ;;  %v515_v41 = vpop.f32.mrb[1].mxu0 }
 0x316   :  { %v207_v42 = vpop.f32.mrb[2].mxu0 }
 0x317   :  { %v211_v43 = vmul.f32 0.01, %v205_v40  ;;  %v208_v44 = vadd.f32 %v207_v42, %v155_v39  ;;  %v516_v45 = vpop.f32.mrb[3].mxu0 }
 0x319   :  { %v212_v46 = vmul.f32 0.01, %v208_v44  ;;  %v213_v47 = vmax.f32 %v205_v40, %v211_v43 }
 0x31b   :  { %v214_v48 = vmax.f32 %v208_v44, %v212_v46 }
 0x31d   :  { %v575_v49 = vpack.i.bf16 %v214_v48, %v213_v47  ;;  %v223_v50 = vpack.c.bf16 %v214_v48, %v213_v47  ;;  %v315_v48 = vld [vmem:[#allocation10 + $0x8] sm:$0xff] }
 0x31f   :  { %576 = vrot.lane.b32.xlu0 %v575_v49, %s752_s4  ;;  %571 = vrot.lane.b32.xlu1 %v575_v49, %s749_s3 }
 0x320   :  { %518 = vmatpush3.bf16.msra.mxu1 %v223_v50 }
 0x321   :  { %519 = vmatprep.subr.bf16.mxu1 %v750_v21 }
 0x323   :  { %228 = vperm.xlu1 %569, %v135_v51  }
 0x391   :  { %v577_v52 = vpop.permute.xlu0 %576  ;;  %v572_v53 = vpop.permute.xlu1 %571 }
 0x392   :  { %v574_v54 = vunpack.i.h.bf16 %v572_v53  ;;  %v573_v55 = vunpack.i.l.bf16 %v572_v53  ;;  %v579_v56 = vunpack.i.h.bf16 %v577_v52  ;;  %v578_v57 = vunpack.i.l.bf16 %v577_v52 }
 0x394   :  { %v224_v58 = vpack.c.bf16 %v574_v54, %v573_v55  ;;  %v225_v59 = vpack.c.bf16 %v579_v56, %v578_v57  ;;  %v313_v57 = vld [vmem:[#allocation8 + $0x4] sm:$0xf] }
 0x396   :  { %520 = vmatpush3.bf16.msra.mxu1 %v224_v58 }
 0x397   :  { %521 = vmatprep.subr.bf16.mxu1 %v750_v21 }
 0x39a   :  { %522 = vmatpush3.bf16.msra.mxu1 %v225_v59 }
 0x39b   :  { %537 = vmatprep.subr.bf16.mxu1 %v750_v21 }
 0x39d   :  { %524 = vmatmul.mubr.msk.bf16.vlgmr.msra.gmra.mrb[0].mxu1 %vm231_vm9, %v134_v60 }
 0x39e   :  { %543 = vmatprep.mubr.msk.bf16.mxu1 %vm751_vm6, %v750_v21 }
 0x3a2   :  { %v229_v61 = vpop.permute.xlu1 %228 }
 0x470   :  { %v269_v62 = vpop.f32.mrb[0].mxu1 }
 0x471   :  { %v270_v63 = vadd.f32 %v269_v62, %v229_v61  ;;  %v525_v0 = vpop.f32.mrb[1].mxu1 }
 0x472   :  { %v272_v1 = vpop.f32.mrb[2].mxu1 }
 0x473   :  { %592 = vtanh.f32 %v270_v63  ;;  %v526_v2 = vpop.f32.mrb[3].mxu1 }
 0x47d   :  { %v593_v3 = vpop.eup %592 }
 0x47e   :  { %276 = vrot.lane.b32.xlu0 %v593_v3, %s755_s30 }
 0x4f0   :  { %v277_v4 = vpop.permute.xlu0 %276 }
 0x4f1   :  { %v278_v5 = vmul.f32 1.442695, %v277_v4 }
 0x4f3   :  { %594 = vpow2.f32 %v278_v5 }
 0x4fd   :  { %v595_v6 = vpop.eup %594 }
 0x4fe   :  { %v281_v7 = vrot.slane %v595_v6, 4 }
 0x500   :  { %v283_v8 = vmul.f32 %v281_v7, %v879_v25  ;;  %v310_v25 = vld [vmem:[#allocation7 + $0x10] sm:$0xff] }
 0x502   :  { %v285_v9 = vrot.slane %v283_v8, 4 }
 0x504   :  { %288 = vrot.lane.b32.xlu0 %v285_v9, %s749_s3  ;;  %290 = vrot.lane.b32.xlu1 %v285_v9, %s748_s27 }
 0x576   :  { %v289_v10 = vpop.permute.xlu0 %288  ;;  %v291_v11 = vpop.permute.xlu1 %290 }
 0x577   :  { %v292_v13 = vsel %vm110_vm4, %v291_v11, %v285_v9 }
 0x578   :  { %v293_v14 = vsel %vm109_vm5, %v289_v10, %v292_v13 }
 0x579   :  { %294 = vrot.lane.b32.xlu0 %v293_v14, %s749_s3  ;;  %296 = vrot.lane.b32.xlu1 %v293_v14, %s748_s27 }
 0x5eb   :  { %v295_v15 = vpop.permute.xlu0 %294  ;;  %v297_v16 = vpop.permute.xlu1 %296 }
 0x5ec   :  { %v298_v17 = vsel %vm110_vm4, %v297_v16, %v293_v14 }
 0x5ed   :  { %v299_v18 = vsel %vm109_vm5, %v295_v15, %v298_v17 }
 0x5ee   :  { %300 = vrot.lane.b32.xlu0 %v299_v18, %s749_s3  ;;  %302 = vrot.lane.b32.xlu1 %v299_v18, %s748_s27 }
 0x660   :  { %v301_v19 = vpop.permute.xlu0 %300  ;;  %v303_v20 = vpop.permute.xlu1 %302 }
 0x661   :  { %v304_v22 = vsel %vm110_vm4, %v303_v20, %v299_v18 }
 0x662   :  { %v925_v23 = vsel %vm109_vm5, %v301_v19, %v304_v22 }
 0x663   :  { %318 = vrot.lane.b32.xlu0 %v925_v23, %s752_s4  ;;  %316 = vrot.lane.b32.xlu1 %v925_v23, %s749_s3 }
 0x667   :  { %322 = vrot.lane.b32.xlu0 %v925_v23, %s753_s28  ;;  %320 = vrot.lane.b32.xlu1 %v925_v23, %s754_s29 }
 0x66b   :  { %334 = vperm.xlu0 %568, %v311_v24   ;;  %329 = vperm.xlu1 %569, %v310_v25  }
 0x6d5   :  { %v319_v26 = vpop.permute.xlu0 %318  ;;  %v317_v12 = vpop.permute.xlu1 %316 }
 0x6d6   :  { %v324_v27 = vpack.c.bf16 %v317_v12, %v925_v23 }
 0x6d8   :  { %528 = vmatpush3.bf16.msra.mxu0 %v324_v27 }
 0x6d9   :  { %v323_v28 = vpop.permute.xlu0 %322  ;;  %v321_v29 = vpop.permute.xlu1 %320  ;;  %529 = vmatprep.subr.bf16.mxu0 %v750_v21 }
 0x6da   :  { %v325_v30 = vpack.c.bf16 %v321_v29, %v319_v26  ;;  %v326_v31 = vpack.c.bf16 %v323_v28, %v323_v28 }
 0x6dc   :  { %530 = vmatpush3.bf16.msra.mxu0 %v325_v30  ;;  %v346_v32 = vsel %vm166_vm7, %v326_v31, 0 }
 0x6dd   :  { %531 = vmatprep.subr.bf16.mxu0 %v750_v21 }
 0x6e0   :  { %532 = vmatpush3.bf16.msra.mxu0 %v346_v32 }
 0x6e3   :  { %534 = vmatmul.mubr.msk.bf16.vlgmr.msra.gmra.mrb[4].mxu0 %vm162_vm8, %v591_v33 }
 0x6ea   :  { %v330_v34 = vpop.permute.xlu1 %329  ;;  %v335_v38 = vpop.permute.xlu0 %334 }
 0x7b6   :  { %v382_v35 = vpop.f32.mrb[4].mxu0 }
 0x7b7   :  { %v383_v36 = vadd.f32 %v382_v35, %v330_v34  ;;  %v535_v37 = vpop.f32.mrb[5].mxu0 }
 0x7b8   :  { %v385_v39 = vpop.f32.mrb[6].mxu0 }
 0x7b9   :  { %v389_v40 = vmul.f32 0.01, %v383_v36  ;;  %v386_v41 = vadd.f32 %v385_v39, %v335_v38  ;;  %v536_v42 = vpop.f32.mrb[7].mxu0 }
 0x7bb   :  { %v390_v43 = vmul.f32 0.01, %v386_v41  ;;  %v391_v44 = vmax.f32 %v383_v36, %v389_v40 }
 0x7bd   :  { %v392_v45 = vmax.f32 %v386_v41, %v390_v43 }
 0x7bf   :  { %v401_v46 = vpack.c.bf16 %v392_v45, %v391_v44  ;;  %v585_v47 = vpack.i.bf16 %v392_v45, %v391_v44 }
 0x7c1   :  { %586 = vrot.lane.b32.xlu0 %v585_v47, %s752_s4  ;;  %581 = vrot.lane.b32.xlu1 %v585_v47, %s749_s3 }
 0x7c2   :  { %538 = vmatpush3.bf16.msra.mxu1 %v401_v46 }
 0x7c3   :  { %539 = vmatprep.subr.bf16.mxu1 %v750_v21 }
 0x7c5   :  { %406 = vperm.xlu1 %569, %v315_v48  }
 0x833   :  { %v587_v49 = vpop.permute.xlu0 %586  ;;  %v582_v50 = vpop.permute.xlu1 %581 }
 0x834   :  { %v584_v51 = vunpack.i.h.bf16 %v582_v50  ;;  %v583_v52 = vunpack.i.l.bf16 %v582_v50  ;;  %v589_v53 = vunpack.i.h.bf16 %v587_v49  ;;  %v588_v54 = vunpack.i.l.bf16 %v587_v49 }
 0x836   :  { %v402_v55 = vpack.c.bf16 %v584_v51, %v583_v52  ;;  %v403_v56 = vpack.c.bf16 %v589_v53, %v588_v54 }
 0x838   :  { %540 = vmatpush3.bf16.msra.mxu1 %v402_v55 }
 0x839   :  { %541 = vmatprep.subr.bf16.mxu1 %v750_v21 }
 0x83c   :  { %542 = vmatpush3.bf16.msra.mxu1 %v403_v56 }
 0x83f   :  { %544 = vmatmul.mubr.msk.bf16.vlgmr.msra.gmra.mrb[4].mxu1 %vm231_vm9, %v313_v57 }
 0x844   :  { %v407_v58 = vpop.permute.xlu1 %406 }
 0x912   :  { %v446_v59 = vpop.f32.mrb[4].mxu1 }
 0x913   :  { %v447_v60 = vadd.f32 %v446_v59, %v407_v58  ;;  %v545_v61 = vpop.f32.mrb[5].mxu1 }
 0x914   :  { %v449_v62 = vpop.f32.mrb[6].mxu1 }
 0x915   :  { %596 = vtanh.f32 %v447_v60  ;;  %v546_v63 = vpop.f32.mrb[7].mxu1 }
 0x91f   :  { %v597_v0 = vpop.eup %596 }
 0x920   :  { %453 = vrot.lane.b32.xlu0 %v597_v0, %s755_s30 }
 0x992   :  { %v454_v1 = vpop.permute.xlu0 %453 }
 0x993   :  { %v456_v2 = vrot.slane %v454_v1, 4 }
 0x995   :  { %v458_v3 = vadd.f32 %v456_v2, %v925_v23  ;;  %v459_v21 = vsub.f32 %v925_v23, %v456_v2 }
 0x997   :  { %v461_v4 = vrot.slane %v458_v3, 4  ;;  %v464_v5 = vrot.slane %v459_v21, 4 }
 0x999   :  { %v466_v6 = vsel %vm166_vm7, %v461_v4, %v464_v5 }
 0x99a   :  { %467 = vst [vmem:[#allocation11] sm:$0xff] %v466_v6 }
 0x99b   :  { %719 = shalt.err (!%p716_p2)
}
 0x99c   :  { %s720_s12 = scalar_lea.hbm %s966_s5, 128 }
 0x99d   :  { %p721_p3 = scmp.ne.s32.totalorder %s966_s5, %s720_s12  ;;  %p724_p4 = scmp.lt.u32.totalorder %s720_s12, %s966_s5 }
 0x99f   :  { %p726_p5 = pnand %p724_p4, %p721_p3 }
 0x9a1   :  { %729 = shalt.err (!%p726_p5)
}
 0x9a2   :  { %477 = dma.vmem_to_hbm [thread:$0]  %s475_s7, 128, %s966_s5, [#allocation4]  }
 0x9a3   :  { %736 = dma.done.wait [#allocation4], 128  }
 0x9a4   :  { %737 = vsyncadd [#allocation4], 4294967168 }
 0x9a5   :  { %481 = vsyncpa [#allocation3], 1 }
 0x9a6   :  { %482 = vsyncpa [#allocation6], 1 }
 0x9a7   :  { %483 = vsyncpa [#allocation9], 1 }
 0x9a8   :  { %484 = vsyncpa [#allocation4], 1 }

</bundles_post_ra>
